<compile_context>
chip_gen: v6e
topology: v6e:2x2x1
jax: 0.10.0
libtpu: 0.0.40
codegen_flags: <defaults>
</compile_context>

<pallas_src>
import math

import jax
import jax.numpy as jnp
from jax.experimental import pallas as pl
from jax.experimental.pallas import tpu as pltpu


# ------------------------------ PE buffer (init) ---------------------------- #

def make_positional_encoding(d_model, max_seq_length=1024, dtype=jnp.float32):
    """Precompute the sinusoidal PE table (mirrors nn.Module.__init__ / register_buffer)."""
    assert d_model % 2 == 0, "d_model must be even (as in the PyTorch module)"
    position = jnp.arange(max_seq_length, dtype=jnp.float32)[:, None]       # (S, 1)
    div_term = jnp.exp(jnp.arange(0, d_model, 2, dtype=jnp.float32)
                       * (-math.log(10000.0) / d_model))                    # (D/2,)
    angles = position * div_term                                            # (S, D/2)
    pe = jnp.zeros((max_seq_length, d_model), jnp.float32)
    pe = pe.at[:, 0::2].set(jnp.sin(angles))
    pe = pe.at[:, 1::2].set(jnp.cos(angles))
    return pe.astype(dtype)   # stored once in the model dtype -> no per-call cast


# -------------------------------- Pallas kernel ----------------------------- #

def _pe_add_kernel(x_ref, pe_ref, o_ref):
    # x_ref : (bt, ts, L)  bt batch rows, ts folded-sequence rows, L lanes
    # pe_ref: (ts, L)      batch-invariant -> stays VMEM resident on inner axis
    # o_ref : (bt, ts, L)
    o_ref[...] = (x_ref[...] + pe_ref[...]).astype(o_ref.dtype)


def _sublane_packing(itemsize):
    # native sublane packing: 8 for 4-byte, 16 for 2-byte, 32 for 1-byte dtypes
    return max(8, 32 // itemsize)


def _pick_tiles(b, r, row_bytes, itemsize, block_budget=2 * 1024 * 1024):
    """Pick (bt, ts): row tile `ts` is a multiple of the dtype's sublane packing
    (or the full row dim for tiny inputs); batch fold `bt` grows the block up to
    ~2 MiB.  Grid uses cdiv, so ts need not divide r."""
    p = _sublane_packing(itemsize)
    if r < p:
        ts = r                                               # full dim: always legal
    else:
        ts = max(p, ((block_budget // 2) // row_bytes) // p * p)
        ts = min(ts, (r // p) * p)
    bt = min(b, max(1, block_budget // (ts * row_bytes)))
    return bt, ts


def positional_encoding_forward(x, pe):
    """x: (B, S, D);  pe: (max_seq, D) precomputed buffer.  Returns x + pe[:S]."""
    b, s, d = x.shape
    max_seq, dd = pe.shape
    assert d == dd and s <= max_seq
    itemsize = jnp.dtype(x.dtype).itemsize

    # ---- lane-dense folding: fold consecutive sequence positions into 128k lanes
    if d % 128 == 0:
        lanes, fold = d, 1
    else:
        lanes = math.lcm(d, 128)
        fold = lanes // d
        if s % fold != 0 or max_seq % fold != 0 or lanes * itemsize > 64 * 1024:
            lanes, fold = d, 1          # fall back to the natural (masked) layout

    r = (s * d) // lanes                # folded row count of the activation
    max_rows = (max_seq * d) // lanes   # folded row count of the PE buffer
    x2 = x.reshape(b, r, lanes)         # free reshape (row-major preserving)
    pe2 = pe.reshape(max_rows, lanes)   # free reshape of the buffer (no copy)

    row_bytes = lanes * itemsize
    bt, ts = _pick_tiles(b, r, row_bytes, itemsize)

    if ts % 8 != 0:
        # Degenerate tiny-sequence case (ts == r < 8 rows): the PE block must
        # equal its array's full row dim to be layout-legal -> slice to r rows.
        # This copies only a few KiB, once per call, and never triggers for
        # realistic sequence lengths.
        pe2 = pe2[:r]

    grid = (pl.cdiv(r, ts), pl.cdiv(b, bt))   # seq tiles outer, batch inner -> pe resident

    cost = pl.CostEstimate(
        flops=b * s * d,
        transcendentals=0,
        bytes_accessed=(2 * b * s * d + s * d) * itemsize)

    out = pl.pallas_call(
        _pe_add_kernel,
        out_shape=jax.ShapeDtypeStruct((b, r, lanes), x.dtype),
        grid_spec=pltpu.PrefetchScalarGridSpec(
            num_scalar_prefetch=0,
            grid=grid,
            in_specs=[
                pl.BlockSpec((bt, ts, lanes), lambda j, i: (i, j, 0)),  # x tile
                pl.BlockSpec((ts, lanes),     lambda j, i: (j, 0)),     # pe tile (batch-invariant)
            ],
            out_specs=pl.BlockSpec((bt, ts, lanes), lambda j, i: (i, j, 0)),
        ),
        compiler_params=pltpu.CompilerParams(
            dimension_semantics=("parallel", "parallel"),
            vmem_limit_bytes=32 * 1024 * 1024),
        cost_estimate=cost,
    )(x2, pe2)

    return out.reshape(b, s, d)


# ----------------------------------- test ----------------------------------- #

if __name__ == "__main__":
    d_model = 32
    max_seq_length = 1024

    pe = make_positional_encoding(d_model, max_seq_length)      # "register_buffer"
    key = jax.random.PRNGKey(0)

    # (batch, seq) cases: tiny (spec shapes), lane-folded multi-tile, ragged rows.
    for batch, seq in ((2, 8), (3, 128), (2, 100)):
        key, sub = jax.random.split(key)
        x = jax.random.normal(sub, (batch, seq, d_model), jnp.float32)

        out = positional_encoding_forward(x, pe)
        out = jax.block_until_ready(out)
        assert out.shape == (batch, seq, d_model)

        ref = x + pe[None, :seq, :]                              # plain-JAX reference
        err = float(jnp.max(jnp.abs(out - ref)))
        assert err < 1e-6, f"shape {(batch, seq, d_model)}: max abs err {err}"

    print("KERNEL_OK")
</pallas_src>

<mosaic_0001>
module attributes {stable_mosaic.version = 11 : i64} {
  func.func @_pe_add_kernel(%arg0: i32, %arg1: i32, %arg2: memref<2x2x128xf32, #tpu.memory_space<vmem>>, %arg3: memref<2x128xf32, #tpu.memory_space<vmem>>, %arg4: memref<2x2x128xf32, #tpu.memory_space<vmem>>) attributes {dimension_semantics = [#tpu.dimension_semantics<parallel>, #tpu.dimension_semantics<parallel>], iteration_bounds = array<i64: 1, 1>, scalar_prefetch = 0 : i64, scratch_operands = 0 : i64, tpu.core_type = #tpu.core_type<tc>, window_params = [{transform_indices = @transform_0, window_bounds = array<i64: 2, 2, 128>}, {transform_indices = @transform_1, window_bounds = array<i64: 2, 128>}, {transform_indices = @transform_2, window_bounds = array<i64: 2, 2, 128>}]} {
    %c0 = arith.constant 0 : index
    %c0_0 = arith.constant 0 : index
    %c0_1 = arith.constant 0 : index
    %0 = vector.load %arg2[%c0, %c0_0, %c0_1] : memref<2x2x128xf32, #tpu.memory_space<vmem>>, vector<2x2x128xf32>
    %c0_2 = arith.constant 0 : index
    %c0_3 = arith.constant 0 : index
    %1 = vector.load %arg3[%c0_2, %c0_3] : memref<2x128xf32, #tpu.memory_space<vmem>>, vector<2x128xf32>
    %2 = vector.shape_cast %1 : vector<2x128xf32> to vector<1x2x128xf32>
    %3 = vector.broadcast %2 : vector<1x2x128xf32> to vector<2x2x128xf32>
    %4 = arith.addf %0, %3 : vector<2x2x128xf32>
    %c0_4 = arith.constant 0 : index
    %c0_5 = arith.constant 0 : index
    %c0_6 = arith.constant 0 : index
    %5 = vector.load %arg4[%c0_4, %c0_5, %c0_6] : memref<2x2x128xf32, #tpu.memory_space<vmem>>, vector<2x2x128xf32>
    tpu.vector_store %arg4[%c0_4, %c0_5, %c0_6], %4 {strides = array<i32>} : memref<2x2x128xf32, #tpu.memory_space<vmem>>, vector<2x2x128xf32>,
    return
  }
  func.func @transform_0(%arg0: i32, %arg1: i32) -> (i32, i32, i32) {
    %c0_i32 = arith.constant 0 : i32
    %c0_i32_0 = arith.constant 0 : i32
    return %arg1, %arg0, %c0_i32 : i32, i32, i32
  }
  func.func @transform_1(%arg0: i32, %arg1: i32) -> (i32, i32) {
    %c0_i32 = arith.constant 0 : i32
    %c0_i32_0 = arith.constant 0 : i32
    return %arg0, %c0_i32 : i32, i32
  }
  func.func @transform_2(%arg0: i32, %arg1: i32) -> (i32, i32, i32) {
    %c0_i32 = arith.constant 0 : i32
    %c0_i32_0 = arith.constant 0 : i32
    return %arg1, %arg0, %c0_i32 : i32, i32, i32
  }
}

</mosaic_0001>

<bundles_post_ra>
// kernel: tpu_custom_call.1
= control target key start
LH: loop header
LB: loop body
LE: loop exit
PB: predicated region body
PF: predicated region fallthrough
CT: control target
= control target key end

     0   :  { %7 = vsyncpa [#allocation3], 0  ;;  %s169_s0 = inlined_call_operand.hbm [shape: f32[2,2,128], index: 0, kind: input, shape index: {}]   ;;  %s170_s1 = inlined_call_operand.hbm [shape: f32[2,128], index: 1, kind: input, shape index: {}]   ;;  %s171_s2 = inlined_call_operand.hbm [shape: f32[2,2,128], index: 2, kind: output, shape index: {}]  }
   0x1   :  { %8 = vsyncpa [#allocation6], 0 }
   0x2   :  { %9 = vsyncpa [#allocation4], 0  ;;  %s134_s9 = smov [#allocation2]  }
   0x3   :  { %s15_s10 = sshll.u32 %s134_s9, 4  ;;  %s16_s10 = int_to_ptr.vmem [resolvable:$true] %s15_s10 }
   0x4   :  { %s76_s11 = scalar_lea.vmem %s16_s10, 64  ;;  %p81_p1 = scmp.lt.s32.totalorder %s16_s10, %s16_s10 }
   0x5   :  { %p77_p0 = scmp.ne.s32.totalorder %s16_s10, %s76_s11  ;;  %p82_p2 = scmp.lt.s32.totalorder %s76_s11, %s76_s11 }
   0x7   :  { %p83_p3 = por %p82_p2, %p81_p1 }
   0x9   :  { %p84_p4 = pnand %p83_p3, %p77_p0 }
   0xb   :  { %87 = shalt.err (!%p84_p4)
}
   0xc   :  { %s135_s12 = smov 32   ;;  %s136_s13 = smov 2  }
   0xd   :  { %21 = dma.hbm_to_vmem [thread:$0]  %s169_s0, 64, %s16_s10, [#allocation3], %s135_s12, %s135_s12, %s136_s13  }
   0xe   :  { %s137_s16 = smov [#allocation5]  }
   0xf   :  { %s28_s17 = sshll.u32 %s137_s16, 4  ;;  %s29_s17 = int_to_ptr.vmem [resolvable:$true] %s28_s17 }
  0x10   :  { %s96_s18 = scalar_lea.vmem %s29_s17, 32  ;;  %p101_p6 = scmp.lt.s32.totalorder %s29_s17, %s29_s17 }
  0x11   :  { %p97_p5 = scmp.ne.s32.totalorder %s29_s17, %s96_s18  ;;  %p102_p7 = scmp.lt.s32.totalorder %s96_s18, %s96_s18 }
  0x13   :  { %p103_p8 = por %p102_p7, %p101_p6 }
  0x15   :  { %p104_p9 = pnand %p103_p8, %p97_p5 }
  0x17   :  { %107 = shalt.err (!%p104_p9)
}
  0x18   :  { %31 = dma.hbm_to_vmem [thread:$0]  %s170_s1, 32, %s29_s17, [#allocation6]  }
  0x19   :  { %128 = dma.done.wait [#allocation3], 64  }
  0x1a   :  { %129 = vsyncadd [#allocation3], 4294967232 }
  0x1b   :  { %130 = dma.done.wait [#allocation6], 32  }
  0x1c   :  { %131 = vsyncadd [#allocation6], 4294967264  ;;  %s138_s21 = smov [#allocation7]   ;;  %v38_v0 = vld [vmem:[#allocation2] sm:$0x3] }
  0x1d   :  { %s50_s0 = sshll.u32 %s138_s21, 4  ;;  %v40_v1 = vld [vmem:[#allocation5] sm:$0x3]  ;;  %v39_v2 = vld [vmem:[#allocation2 + $0x2] sm:$0x3]  ;;  %s51_s0 = int_to_ptr.vmem [resolvable:$true] %s50_s0 }
  0x1e   :  { %v41_v3 = vadd.f32 %v40_v1, %v38_v0  ;;  %v42_v4 = vadd.f32 %v40_v1, %v39_v2  ;;  %s108_s22 = scalar_lea.vmem %s51_s0, 64  ;;  %p113_p11 = scmp.lt.s32.totalorder %s51_s0, %s51_s0 }
  0x1f   :  { %p109_p10 = scmp.ne.s32.totalorder %s51_s0, %s108_s22  ;;  %p114_p12 = scmp.lt.s32.totalorder %s108_s22, %s108_s22 }
  0x20   :  { %43 = vst [vmem:[#allocation7] sm:$0x3] %v41_v3  ;;  %44 = vst [vmem:[#allocation7 + $0x2] sm:$0x3] %v42_v4 }
  0x21   :  { %p115_p13 = por %p114_p12, %p113_p11 }
  0x23   :  { %p116_p0 = pnand %p115_p13, %p109_p10 }
  0x25   :  { %119 = shalt.err (!%p116_p0)
}
  0x26   :  { %56 = dma.vmem_to_hbm [thread:$0]  %s51_s0, 64, %s171_s2, [#allocation4], %s135_s12, %s135_s12, %s136_s13  }
  0x27   :  { %132 = dma.done.wait [#allocation4], 64  }
  0x28   :  { %133 = vsyncadd [#allocation4], 4294967232 }
  0x29   :  { %60 = vsyncpa [#allocation3], 1 }
  0x2a   :  { %61 = vsyncpa [#allocation6], 1 }
  0x2b   :  { %62 = vsyncpa [#allocation4], 1 }

</bundles_post_ra>
